<compile_context>
chip_gen: v7x
topology: tpu7x:2x2x1
jax: 0.10.0
libtpu: 0.0.40
codegen_flags: <defaults>
</compile_context>

<pallas_src>
import jax
import jax.numpy as jnp
from jax.experimental import pallas as pl
from jax.experimental.pallas import tpu as pltpu


def _gain_kernel(scale_ref, x_ref, o_ref):
    # scale_ref: scalar-prefetch SMEM ref with the amplitude ratio (f32[1])
    # x_ref / o_ref: (rows, tile_t) VMEM tiles of the flattened waveform
    s = scale_ref[0]
    x = x_ref[...].astype(jnp.float32)
    o_ref[...] = jnp.clip(x * s, -1.0, 1.0).astype(o_ref.dtype)


def _pick_rows(n, itemsize):
    """Rows of the (rows, n//rows) flattened layout: sublane-dense if possible."""
    sublane = 8 if itemsize >= 4 else 16
    for r in (sublane, 8, 4, 2, 1):
        if r <= sublane and n % r == 0:
            return r
    return 1


def _choose_tile_t(rows, cols, itemsize, max_block_bytes, padded_cap_bytes):
    """Lane-axis tile: budget on real bytes, cap the padded VMEM footprint."""
    sublane = 8 if itemsize >= 4 else 16
    padded_rows = max(rows, sublane)

    tile_t = max_block_bytes // (rows * itemsize)                # real-byte budget
    tile_t = min(tile_t, padded_cap_bytes // (padded_rows * itemsize))  # VMEM cap
    tile_t = max(128, (tile_t // 128) * 128)                     # lane-dense

    if tile_t >= cols:
        if cols > 1024:
            # Keep >= 2 grid steps so the "parallel" axis can shard across
            # v7x's 2 TensorCores instead of leaving one idle.
            half = pl.cdiv(cols, 2)
            tile_t = ((half + 127) // 128) * 128
        else:
            tile_t = cols  # single full-extent block (exempt from the 128 rule)
    return tile_t


def gain_forward(audio, key, min_gain=-20, max_gain=-1, *,
                 max_block_bytes=2 << 20,      # real bytes per grid step
                 padded_cap_bytes=3 << 20,     # padded VMEM per block (x4 pipelined)
                 small_input_bytes=64 << 10,   # below this, skip pallas_call
                 donate_input=False):
    """Apply a random dB gain (like torchaudio_augmentations.Gain) with Pallas.

    audio: floating-point waveform of any shape (..., samples); dtype preserved.
    key:   jax PRNG key controlling the random integer gain.
    """
    audio = jnp.asarray(audio)
    if not jnp.issubdtype(audio.dtype, jnp.floating):
        audio = audio.astype(jnp.float32)
    orig_shape = audio.shape
    out_dtype = audio.dtype
    itemsize = jnp.dtype(out_dtype).itemsize

    # Random integer gain in dB, [min_gain, max_gain) like torch.randint.
    gain_db = jax.random.randint(key, (), min_gain, max_gain).astype(jnp.float32)
    scale = jnp.power(10.0, gain_db / 20.0).reshape((1,))  # amplitude ratio

    n = audio.size
    if n * itemsize <= small_input_bytes:
        # Tiny clip: kernel-launch + pipeline prologue would dwarf the HBM
        # traffic; XLA's fused elementwise is already optimal here.
        out = jnp.clip(audio.astype(jnp.float32) * scale[0], -1.0, 1.0)
        return out.astype(out_dtype).reshape(orig_shape)

    # Flatten to a sublane-dense 2D layout (contiguous reshape -> no data move).
    rows = _pick_rows(n, itemsize)
    cols = n // rows
    x2d = audio.reshape(rows, cols)

    tile_t = _choose_tile_t(rows, cols, itemsize, max_block_bytes, padded_cap_bytes)
    grid = (pl.cdiv(cols, tile_t),)  # ragged last block masked by Pallas

    extra = {}
    if donate_input:
        # Operand 1 is the waveform (operand 0 is the scalar-prefetch scale).
        extra["input_output_aliases"] = {1: 0}

    out = pl.pallas_call(
        _gain_kernel,
        out_shape=jax.ShapeDtypeStruct((rows, cols), out_dtype),
        grid_spec=pltpu.PrefetchScalarGridSpec(
            num_scalar_prefetch=1,  # `scale` lands in SMEM
            grid=grid,
            in_specs=[
                pl.BlockSpec((rows, tile_t), lambda j, scale: (0, j)),
            ],
            out_specs=pl.BlockSpec((rows, tile_t), lambda j, scale: (0, j)),
        ),
        compiler_params=pltpu.CompilerParams(
            dimension_semantics=("parallel",),
        ),
        cost_estimate=pl.CostEstimate(
            flops=2 * n, transcendentals=0, bytes_accessed=2 * n * itemsize),
        **extra,
    )(scale, x2d)

    return out.reshape(orig_shape)


def _reference(audio, key, min_gain=-20, max_gain=-1):
    audio = jnp.asarray(audio)
    gain_db = jax.random.randint(key, (), min_gain, max_gain).astype(jnp.float32)
    scale = 10.0 ** (gain_db / 20.0)
    out = jnp.clip(audio.astype(jnp.float32) * scale, -1.0, 1.0)
    return out.astype(audio.dtype)


if __name__ == "__main__":
    key = jax.random.PRNGKey(0)
    k_audio, k_gain = jax.random.split(key)

    # 1) Stereo f32 clip (1 s @ 48 kHz) -> Pallas path; sample axis splits into
    #    2 parallel grid steps (megacore-friendly) with a ragged masked tail.
    stereo = jax.random.uniform(k_audio, (2, 48000), jnp.float32, minval=-1.0, maxval=1.0)
    out = jax.block_until_ready(gain_forward(stereo, k_gain, min_gain=-20, max_gain=-1))
    ref = _reference(stereo, k_gain)
    assert out.shape == stereo.shape and out.dtype == stereo.dtype
    assert jnp.allclose(out, ref, atol=1e-6), "mismatch vs reference (stereo f32)"

    # 2) Same clip in bf16: HBM traffic halves; kernel upcasts to f32 internally
    #    and writes bf16 back out.
    stereo_bf16 = stereo.astype(jnp.bfloat16)
    out_bf16 = jax.block_until_ready(gain_forward(stereo_bf16, k_gain))
    ref_bf16 = _reference(stereo_bf16, k_gain)
    assert out_bf16.dtype == jnp.bfloat16
    assert jnp.allclose(out_bf16.astype(jnp.float32), ref_bf16.astype(jnp.float32),
                        atol=1e-2), "mismatch vs reference (stereo bf16)"

    # 3) Forced tiny blocks on a short clip -> multi-step grid with a ragged
    #    last block, exercising Pallas's boundary-masking path.
    short = jax.random.uniform(k_audio, (2, 3000), jnp.float32, minval=-1.0, maxval=1.0)
    out_s = jax.block_until_ready(
        gain_forward(short, k_gain, small_input_bytes=0, max_block_bytes=8 * 512 * 4))
    assert jnp.allclose(out_s, _reference(short, k_gain), atol=1e-6), \
        "mismatch vs reference (ragged grid)"

    # 4) Tiny odd-length mono clip -> small-input fast path (no pallas_call).
    mono = jax.random.uniform(k_audio, (3001,), jnp.float32, minval=-1.0, maxval=1.0)
    out_m = jax.block_until_ready(gain_forward(mono, k_gain))
    assert out_m.shape == mono.shape
    assert jnp.allclose(out_m, _reference(mono, k_gain), atol=1e-6), \
        "mismatch vs reference (mono fast path)"

    print("KERNEL_OK")
</pallas_src>

<mosaic_0001>
module attributes {stable_mosaic.version = 11 : i64} {
  func.func @_gain_kernel(%arg0: i32, %arg1: memref<1xf32, #tpu.memory_space<smem>>, %arg2: memref<8x6016xf32, #tpu.memory_space<vmem>>, %arg3: memref<8x6016xf32, #tpu.memory_space<vmem>>) attributes {dimension_semantics = [#tpu.dimension_semantics<parallel>], iteration_bounds = array<i64: 2>, scalar_prefetch = 1 : i64, scratch_operands = 0 : i64, tpu.core_type = #tpu.core_type<tc>, window_params = [{transform_indices = @transform_0, window_bounds = array<i64: 8, 6016>}, {transform_indices = @transform_1, window_bounds = array<i64: 8, 6016>}]} {
    %c0 = arith.constant 0 : index
    %0 = memref.load %arg1[%c0] : memref<1xf32, #tpu.memory_space<smem>>
    %c0_0 = arith.constant 0 : index
    %c0_1 = arith.constant 0 : index
    %1 = vector.load %arg2[%c0_0, %c0_1] : memref<8x6016xf32, #tpu.memory_space<vmem>>, vector<8x6016xf32>
    %2 = vector.broadcast %0 : f32 to vector<8x6016xf32>
    %3 = arith.mulf %1, %2 : vector<8x6016xf32>
    %cst = arith.constant -1.000000e+00 : f32
    %cst_2 = arith.constant 1.000000e+00 : f32
    %4 = vector.broadcast %cst : f32 to vector<8x6016xf32>
    %5 = arith.maximumf %4, %3 : vector<8x6016xf32>
    %6 = vector.broadcast %cst_2 : f32 to vector<8x6016xf32>
    %7 = arith.minimumf %6, %5 : vector<8x6016xf32>
    %c0_3 = arith.constant 0 : index
    %c0_4 = arith.constant 0 : index
    %8 = vector.load %arg3[%c0_3, %c0_4] : memref<8x6016xf32, #tpu.memory_space<vmem>>, vector<8x6016xf32>
    tpu.vector_store %arg3[%c0_3, %c0_4], %7 {strides = array<i32>} : memref<8x6016xf32, #tpu.memory_space<vmem>>, vector<8x6016xf32>,
    return
  }
  func.func @transform_0(%arg0: i32, %arg1: memref<1xf32, #tpu.memory_space<smem>>) -> (i32, i32) {
    %c0_i32 = arith.constant 0 : i32
    %c0_i32_0 = arith.constant 0 : i32
    return %c0_i32, %arg0 : i32, i32
  }
  func.func @transform_1(%arg0: i32, %arg1: memref<1xf32, #tpu.memory_space<smem>>) -> (i32, i32) {
    %c0_i32 = arith.constant 0 : i32
    %c0_i32_0 = arith.constant 0 : i32
    return %c0_i32, %arg0 : i32, i32
  }
}

</mosaic_0001>

<bundles_post_ra>
// kernel: tpu_custom_call.1
= control target key start
LH: loop header
LB: loop body
LE: loop exit
PB: predicated region body
PF: predicated region fallthrough
CT: control target
= control target key end

     0   :  { %s989_s0 = inlined_call_operand.<no memory space> [shape: f32[1], index: 0, kind: input, shape index: {}]   ;;  %s990_s1 = inlined_call_operand.hbm [shape: f32[8,12000], index: 1, kind: input, shape index: {}]   ;;  %s991_s2 = inlined_call_operand.hbm [shape: f32[8,12000], index: 2, kind: output, shape index: {}]  }
   0x1   :  { %7 = sst [smem:[#allocation3]] %s989_s0 }
   0x2   :  { %8 = vsyncpa [#allocation5], 0 }
   0x3   :  { %10 = vsyncpa [#allocation5 + $0x1], 0 }
   0x4   :  { %11 = vsyncpa [#allocation6], 0 }
   0x5   :  { %13 = vsyncpa [#allocation6 + $0x1], 0  ;;  %s682_s11 = smov 0   ;;  %s684_s12 = smov 0  }
   0x6   :  { %s686_s13 = smov 0   ;;  %s688_s14 = smov 0  }
   0x7 LB: > { %s703_s0 = sadd.s32 4294967295, %s660_s14   ;;  %s459_s15 = sadd.s32 4294967294, %s660_s14   ;;  %s660_s14 = sphi %s688_s14, %s1005_s14   ;;  %s656_s13 = sphi %s686_s13, %s1004_s13   ;;  %s652_s12 = sphi %s684_s12, %s1003_s12   ;;  %s648_s11 = sphi %s682_s11, %s1002_s11  }
   0x8   : > { %s707_s16 = sadd.s32 1, %s660_s14   ;;  %s26_s17 = sadd.s32 1, %s656_s13 }
   0x9   : > { %s23_s18 = ssub.s32 %s660_s14, %s707_s16  ;;  %p33_p0 = scmp.ne.s32.totalorder %s656_s13, %s652_s12 }
   0xa   : > { %p24_p1 = scmp.eq.s32.totalorder %s23_s18, 0  ;;  %p34_p2 = scmp.eq.s32.totalorder %s660_s14, 0 }
   0xb   : > { %p39_p3 = scmp.ne.s32.totalorder %s652_s12, %s648_s11  ;;  %p40_p4 = scmp.eq.s32.totalorder %s703_s0, 0 }
   0xc   : > { %s719_s19 = scalar_select %p24_p1, %s656_s13, %s26_s17  }
   0xd   : > { %p35_p5 = por %p34_p2, %p33_p0  ;;  %p721_p6 = por %p40_p4, %p39_p3 }
   0xe   : > { %p63_p7 = scmp.eq.s32.totalorder %s703_s0, 1  ;;  %p69_p8 = scmp.eq.s32.totalorder %s459_s15, 1 }
   0xf   : > { %p530_p10 = scmp.lt.s32.totalorder %s660_s14, 2  ;;  %s89_s23 = sand.u32 1, %s656_s13  }
  0x10   : > { %p728_p11 = por %p63_p7, %p33_p0  ;;  %p732_p12 = por %p69_p8, %p39_p3 }
  0x11   : > { %s514_s24 = smul.u32 6016, %s660_s14  ;;  %p743_p13 = pnand %p530_p10, %p35_p5 }
  0x12   : > { %s994_s21 = scalar_select %p728_p11, 1, 0 }
  0x13   : > { %s995_s22 = scalar_select %p732_p12, 1, 0 }
  0x14   : > { %s516_s25 = smul.u32 376, %s89_s23  ;;  %s741_s28 = scalar_lea.hbm %s990_s1, %s514_s24 }
  0x15   : > { %s90_s4 = scalar_lea.sflag [#allocation5], %s89_s23  ;;  %s564_s5 = scalar_lea.hbm %s741_s28, 6016 }
  0x16   : > { %s93_s30 = scalar_lea.vmem [#allocation4], %s516_s25  ;;  %p565_p2 = scmp.ne.s32.totalorder %s741_s28, %s564_s5 }
  0x17   : > { %s101_s3 = sshll.u32 %s93_s30, 4  ;;  %p566_p3 = pneg %p743_p13  ;;  %s748_s3 = int_to_ptr.vmem [resolvable:$true] %s101_s3 }
  0x18   : > { %s569_s8 = scalar_lea.hbm %s990_s1, 12032  ;;  %p570_p7 = scmp.lt.u32.totalorder %s741_s28, %s990_s1 }
  0x19   : > { %p567_p4 = pnand %p566_p3, %p565_p2  ;;  %p571_p8 = scmp.lt.u32.totalorder %s569_s8, %s564_s5 }
  0x1a   : > { %p573_p9 = scmp.lt.u32.totalorder %s564_s5, %s741_s28 }
  0x1b   : > { %p568_p5 = pneg %p567_p4  ;;  %p572_p10 = por %p571_p8, %p570_p7 }
  0x1d   : > { %p574_p0 = por %p573_p9, %p572_p10 }
  0x1f   : > { %p575_p1 = pnand %p574_p0, %p568_p5 }
  0x21   : > { %578 = shalt.err (!%p575_p1)
}
  0x22   : > { %s579_s15 = scalar_lea.vmem %s748_s3, 6016  ;;  %s662_s17 = smov [#allocation4]  }
  0x23   : > { %p580_p2 = scmp.ne.s32.totalorder %s748_s3, %s579_s15  ;;  %s584_s18 = sshll.u32 %s662_s17, 4  ;;  %s585_s18 = int_to_ptr.vmem [resolvable:$false] %s584_s18 }
  0x24   : > { %s586_s23 = scalar_lea.vmem %s585_s18, 12032  ;;  %p587_p11 = scmp.lt.s32.totalorder %s748_s3, %s585_s18 }
  0x25   : > { %p582_p4 = pnand %p580_p2, %p566_p3  ;;  %p588_p7 = scmp.lt.s32.totalorder %s586_s23, %s579_s15 }
  0x27   : > { %p583_p12 = pneg %p582_p4  ;;  %p589_p8 = por %p588_p7, %p587_p11 }
  0x29   : > { %p590_p9 = pnand %p589_p8, %p583_p12 }
  0x2b   : > { %593 = shalt.err (!%p590_p9)
}
  0x2c   : > { %525 = dma.hbm_to_vmem [thread:$0]  (!%p743_p13), %s741_s28, 6016, %s748_s3, %s90_s4  }
  0x2d   : > { %p997_p0 = scmp.lt.s32.totalorder %s660_s14, 3  ;;  %p998_p1 = scmp.ge.s32.totalorder %s660_s14, 1 }
  0x2f   : > { %p107_p3 = pnand %p998_p1, %p997_p0 }
  0x30   : > { %s781_s24 = sand.u32 (!%p107_p3), 1, %s652_s12  }
  0x31   : > { %110 = sbr.rel (%p107_p3) target bundleno = 105 (0x69), region = 24  ;;  %s113_s26 = scalar_lea.sflag (!%p107_p3), [#allocation5], %s781_s24 }
  0x32   : > { %s517_s25 = smul.u32 (!%p107_p3), 376, %s781_s24 }
  0x34   : > { %s787_s27 = scalar_lea.vmem (!%p107_p3), [#allocation4], %s517_s25 }
  0x38   : > { %639 = dma.done.wait (%p721_p6), %s113_s26, 6016  }
  0x39   : > { %641 = vsyncadd (%p721_p6), %s113_s26, 4294961280  ;;  %s137_s28 = sld [smem:[#allocation3]]  ;;  %v138_v0 = vld [vmem:[%s787_s27] sm:$0xff]  ;;  %v139_v2 = vld [vmem:[%s787_s27 + $0x8] sm:$0xff]  ;;  %s820_s20 = scalar_lea.vmem [#allocation7], %s517_s25 }
  0x3a   : > { %v140_v3 = vld [vmem:[%s787_s27 + $0x10] sm:$0xff]  ;;  %v141_v7 = vld [vmem:[%s787_s27 + $0x18] sm:$0xff]  ;;  %v142_v8 = vld [vmem:[%s787_s27 + $0x20] sm:$0xff]  ;;  %s515_s29 = smul.u32 6016, %s703_s0  ;;  %s389_s30 = sshll.u32 %s820_s20, 4  ;;  %s943_s30 = int_to_ptr.vmem [resolvable:$true] %s389_s30 }
  0x3b   : > { %v143_v9 = vld [vmem:[%s787_s27 + $0x28] sm:$0xff]  ;;  %v144_v13 = vld [vmem:[%s787_s27 + $0x30] sm:$0xff]  ;;  %v145_v14 = vld [vmem:[%s787_s27 + $0x38] sm:$0xff]  ;;  %s375_s5 = scalar_lea.sflag [#allocation6], %s781_s24  ;;  %s594_s6 = scalar_lea.vmem %s943_s30, 6016 }
  0x3c   : > { %v146_v15 = vld [vmem:[%s787_s27 + $0x40] sm:$0xff]  ;;  %v147_v20 = vld [vmem:[%s787_s27 + $0x48] sm:$0xff]  ;;  %v148_v21 = vld [vmem:[%s787_s27 + $0x50] sm:$0xff]  ;;  %s941_s4 = scalar_lea.hbm %s991_s2, %s515_s29  ;;  %p595_p6 = scmp.ne.s32.totalorder %s943_s30, %s594_s6 }
  0x3d   : > { %v149_v22 = vld [vmem:[%s787_s27 + $0x58] sm:$0xff]  ;;  %v150_v27 = vld [vmem:[%s787_s27 + $0x60] sm:$0xff]  ;;  %v151_v28 = vld [vmem:[%s787_s27 + $0x68] sm:$0xff]  ;;  %p999_p11 = scmp.ne.s32.totalorder %s994_s21, 0  ;;  %s663_s7 = smov [#allocation7]  }
  0x3e   : > { %v152_v29 = vld [vmem:[%s787_s27 + $0x70] sm:$0xff]  ;;  %v153_v34 = vld [vmem:[%s787_s27 + $0x78] sm:$0xff]  ;;  %v154_v39 = vld [vmem:[%s787_s27 + $0x80] sm:$0xff]  ;;  %s598_s8 = sshll.u32 %s663_s7, 4  ;;  %s599_s8 = int_to_ptr.vmem [resolvable:$false] %s598_s8 }
  0x3f   : > { %v794_v1 = vstv %s137_s28  ;;  %v155_v40 = vld [vmem:[%s787_s27 + $0x88] sm:$0xff]  ;;  %v156_v41 = vld [vmem:[%s787_s27 + $0x90] sm:$0xff]  ;;  %v157_v46 = vld [vmem:[%s787_s27 + $0x98] sm:$0xff]  ;;  %p596_p12 = pnand %p595_p6, %p999_p11  ;;  %s600_s9 = scalar_lea.vmem %s599_s8, 12032 }
  0x40   : > { %v186_v4 = vmul.f32 %v794_v1, %v138_v0  ;;  %v187_v5 = vmul.f32 %v794_v1, %v139_v2  ;;  %v188_v6 = vmul.f32 %v794_v1, %v140_v3  ;;  %v189_v10 = vmul.f32 %v794_v1, %v141_v7  ;;  %v158_v47 = vld [vmem:[%s787_s27 + $0xa0] sm:$0xff]  ;;  %v159_v48 = vld [vmem:[%s787_s27 + $0xa8] sm:$0xff]  ;;  %v160_v53 = vld [vmem:[%s787_s27 + $0xb0] sm:$0xff]  ;;  %p601_p5 = scmp.lt.s32.totalorder %s943_s30, %s599_s8  ;;  %p602_p10 = scmp.lt.s32.totalorder %s600_s9, %s594_s6 }
  0x41   : > { %v190_v11 = vmul.f32 %v794_v1, %v142_v8  ;;  %v191_v12 = vmul.f32 %v794_v1, %v143_v9  ;;  %v192_v19 = vmul.f32 %v794_v1, %v144_v13  ;;  %v193_v26 = vmul.f32 %v794_v1, %v145_v14  ;;  %v161_v58 = vld [vmem:[%s787_s27 + $0xb8] sm:$0xff]  ;;  %v162_v63 = vld [vmem:[%s787_s27 + $0xc0] sm:$0xff]  ;;  %v163_v0 = vld [vmem:[%s787_s27 + $0xc8] sm:$0xff]  ;;  %p597_p13 = pneg %p596_p12 }
  0x42   : > { %v464_v16 = vclamps-f32 %v186_v4, 1.0  ;;  %v465_v17 = vclamps-f32 %v187_v5, 1.0  ;;  %v466_v18 = vclamps-f32 %v188_v6, 1.0  ;;  %v467_v23 = vclamps-f32 %v189_v10, 1.0  ;;  %v164_v2 = vld [vmem:[%s787_s27 + $0xd0] sm:$0xff]  ;;  %v165_v7 = vld [vmem:[%s787_s27 + $0xd8] sm:$0xff]  ;;  %p603_p2 = por %p602_p10, %p601_p5 }
  0x43   : > { %v468_v24 = vclamps-f32 %v190_v11, 1.0  ;;  %v469_v25 = vclamps-f32 %v191_v12, 1.0  ;;  %v470_v30 = vclamps-f32 %v192_v19, 1.0  ;;  %v194_v31 = vmul.f32 %v794_v1, %v146_v15  ;;  %v166_v8 = vld [vmem:[%s787_s27 + $0xe0] sm:$0xff]  ;;  %v167_v9 = vld [vmem:[%s787_s27 + $0xe8] sm:$0xff]  ;;  %v168_v14 = vld [vmem:[%s787_s27 + $0xf0] sm:$0xff] }
  0x44   : > { %327 = vst [vmem:[%s820_s20] sm:$0xff] %v464_v16  ;;  %328 = vst [vmem:[%s820_s20 + $0x8] sm:$0xff] %v465_v17  ;;  %v195_v32 = vmul.f32 %v794_v1, %v147_v20  ;;  %v196_v33 = vmul.f32 %v794_v1, %v148_v21  ;;  %v471_v35 = vclamps-f32 %v193_v26, 1.0  ;;  %v197_v36 = vmul.f32 %v794_v1, %v149_v22  ;;  %v169_v19 = vld [vmem:[%s787_s27 + $0xf8] sm:$0xff]  ;;  %v172_v26 = vld [vmem:[%s787_s27 + $0x110] sm:$0xff]  ;;  %p604_p4 = pnand %p603_p2, %p597_p13 }
  0x45   : > { %329 = vst [vmem:[%s820_s20 + $0x10] sm:$0xff] %v466_v18  ;;  %330 = vst [vmem:[%s820_s20 + $0x18] sm:$0xff] %v467_v23  ;;  %v198_v37 = vmul.f32 %v794_v1, %v150_v27  ;;  %v199_v38 = vmul.f32 %v794_v1, %v151_v28  ;;  %v472_v42 = vclamps-f32 %v194_v31, 1.0  ;;  %v200_v45 = vmul.f32 %v794_v1, %v152_v29  ;;  %v173_v31 = vld [vmem:[%s787_s27 + $0x118] sm:$0xff] }
  0x46   : > { %331 = vst [vmem:[%s820_s20 + $0x20] sm:$0xff] %v468_v24  ;;  %332 = vst [vmem:[%s820_s20 + $0x28] sm:$0xff] %v469_v25  ;;  %v473_v43 = vclamps-f32 %v195_v32, 1.0  ;;  %v474_v44 = vclamps-f32 %v196_v33, 1.0  ;;  %v475_v49 = vclamps-f32 %v197_v36, 1.0  ;;  %v201_v52 = vmul.f32 %v794_v1, %v153_v34  ;;  %v170_v24 = vld [vmem:[%s787_s27 + $0x100] sm:$0xff] }
  0x47   : > { %333 = vst [vmem:[%s820_s20 + $0x30] sm:$0xff] %v470_v30  ;;  %334 = vst [vmem:[%s820_s20 + $0x38] sm:$0xff] %v471_v35  ;;  %v476_v50 = vclamps-f32 %v198_v37, 1.0  ;;  %v477_v51 = vclamps-f32 %v199_v38, 1.0  ;;  %v478_v54 = vclamps-f32 %v200_v45, 1.0  ;;  %v202_v55 = vmul.f32 %v794_v1, %v154_v39  ;;  %v171_v25 = vld [vmem:[%s787_s27 + $0x108] sm:$0xff] }
  0x48   : > { %335 = vst [vmem:[%s820_s20 + $0x40] sm:$0xff] %v472_v42  ;;  %336 = vst [vmem:[%s820_s20 + $0x48] sm:$0xff] %v473_v43  ;;  %v203_v56 = vmul.f32 %v794_v1, %v155_v40  ;;  %v204_v57 = vmul.f32 %v794_v1, %v156_v41  ;;  %v479_v59 = vclamps-f32 %v201_v52, 1.0  ;;  %v205_v60 = vmul.f32 %v794_v1, %v157_v46  ;;  %v174_v32 = vld [vmem:[%s787_s27 + $0x120] sm:$0xff]  ;;  %v175_v33 = vld [vmem:[%s787_s27 + $0x128] sm:$0xff] }
  0x49   : > { %337 = vst [vmem:[%s820_s20 + $0x50] sm:$0xff] %v474_v44  ;;  %338 = vst [vmem:[%s820_s20 + $0x58] sm:$0xff] %v475_v49  ;;  %v206_v61 = vmul.f32 %v794_v1, %v158_v47  ;;  %v207_v62 = vmul.f32 %v794_v1, %v159_v48  ;;  %v480_v3 = vclamps-f32 %v202_v55, 1.0  ;;  %v208_v6 = vmul.f32 %v794_v1, %v160_v53  ;;  %v176_v38 = vld [vmem:[%s787_s27 + $0x130] sm:$0xff]  ;;  %v177_v43 = vld [vmem:[%s787_s27 + $0x138] sm:$0xff] }
  0x4a   : > { %339 = vst [vmem:[%s820_s20 + $0x60] sm:$0xff] %v476_v50  ;;  %340 = vst [vmem:[%s820_s20 + $0x68] sm:$0xff] %v477_v51  ;;  %v481_v4 = vclamps-f32 %v203_v56, 1.0  ;;  %v482_v5 = vclamps-f32 %v204_v57, 1.0  ;;  %v483_v10 = vclamps-f32 %v205_v60, 1.0  ;;  %v209_v13 = vmul.f32 %v794_v1, %v161_v58  ;;  %v178_v48 = vld [vmem:[%s787_s27 + $0x140] sm:$0xff] }
  0x4b   : > { %341 = vst [vmem:[%s820_s20 + $0x70] sm:$0xff] %v478_v54  ;;  %342 = vst [vmem:[%s820_s20 + $0x78] sm:$0xff] %v479_v59  ;;  %v484_v11 = vclamps-f32 %v206_v61, 1.0  ;;  %v485_v12 = vclamps-f32 %v207_v62, 1.0  ;;  %v486_v15 = vclamps-f32 %v208_v6, 1.0  ;;  %v210_v16 = vmul.f32 %v794_v1, %v162_v63  ;;  %v179_v49 = vld [vmem:[%s787_s27 + $0x148] sm:$0xff] }
  0x4c   : > { %343 = vst [vmem:[%s820_s20 + $0x80] sm:$0xff] %v480_v3  ;;  %344 = vst [vmem:[%s820_s20 + $0x88] sm:$0xff] %v481_v4  ;;  %v211_v17 = vmul.f32 %v794_v1, %v163_v0  ;;  %v212_v18 = vmul.f32 %v794_v1, %v164_v2  ;;  %v487_v20 = vclamps-f32 %v209_v13, 1.0  ;;  %v213_v21 = vmul.f32 %v794_v1, %v165_v7  ;;  %v180_v50 = vld [vmem:[%s787_s27 + $0x150] sm:$0xff]  ;;  %v181_v55 = vld [vmem:[%s787_s27 + $0x158] sm:$0xff] }
  0x4d   : > { %345 = vst [vmem:[%s820_s20 + $0x90] sm:$0xff] %v482_v5  ;;  %346 = vst [vmem:[%s820_s20 + $0x98] sm:$0xff] %v483_v10  ;;  %v214_v22 = vmul.f32 %v794_v1, %v166_v8  ;;  %v215_v23 = vmul.f32 %v794_v1, %v167_v9  ;;  %v488_v27 = vclamps-f32 %v210_v16, 1.0  ;;  %v216_v30 = vmul.f32 %v794_v1, %v168_v14  ;;  %v182_v56 = vld [vmem:[%s787_s27 + $0x160] sm:$0xff]  ;;  %v183_v57 = vld [vmem:[%s787_s27 + $0x168] sm:$0xff] }
  0x4e   : > { %347 = vst [vmem:[%s820_s20 + $0xa0] sm:$0xff] %v484_v11  ;;  %348 = vst [vmem:[%s820_s20 + $0xa8] sm:$0xff] %v485_v12  ;;  %v489_v28 = vclamps-f32 %v211_v17, 1.0  ;;  %v490_v29 = vclamps-f32 %v212_v18, 1.0  ;;  %v491_v34 = vclamps-f32 %v213_v21, 1.0  ;;  %v217_v37 = vmul.f32 %v794_v1, %v169_v19  ;;  %v184_v62 = vld [vmem:[%s787_s27 + $0x170] sm:$0xff] }
  0x4f   : > { %349 = vst [vmem:[%s820_s20 + $0xb0] sm:$0xff] %v486_v15  ;;  %350 = vst [vmem:[%s820_s20 + $0xb8] sm:$0xff] %v487_v20  ;;  %v492_v35 = vclamps-f32 %v214_v22, 1.0  ;;  %v493_v36 = vclamps-f32 %v215_v23, 1.0  ;;  %v494_v39 = vclamps-f32 %v216_v30, 1.0  ;;  %v218_v40 = vmul.f32 %v794_v1, %v170_v24 }
  0x50   : > { %351 = vst [vmem:[%s820_s20 + $0xc0] sm:$0xff] %v488_v27  ;;  %352 = vst [vmem:[%s820_s20 + $0xc8] sm:$0xff] %v489_v28  ;;  %v219_v41 = vmul.f32 %v794_v1, %v171_v25  ;;  %v220_v42 = vmul.f32 %v794_v1, %v172_v26  ;;  %v495_v44 = vclamps-f32 %v217_v37, 1.0  ;;  %v221_v45 = vmul.f32 %v794_v1, %v173_v31 }
  0x51   : > { %353 = vst [vmem:[%s820_s20 + $0xd0] sm:$0xff] %v490_v29  ;;  %354 = vst [vmem:[%s820_s20 + $0xd8] sm:$0xff] %v491_v34  ;;  %v222_v46 = vmul.f32 %v794_v1, %v174_v32  ;;  %v223_v47 = vmul.f32 %v794_v1, %v175_v33  ;;  %v496_v51 = vclamps-f32 %v218_v40, 1.0  ;;  %v224_v54 = vmul.f32 %v794_v1, %v176_v38 }
  0x52   : > { %355 = vst [vmem:[%s820_s20 + $0xe0] sm:$0xff] %v492_v35  ;;  %356 = vst [vmem:[%s820_s20 + $0xe8] sm:$0xff] %v493_v36  ;;  %v497_v52 = vclamps-f32 %v219_v41, 1.0  ;;  %v498_v53 = vclamps-f32 %v220_v42, 1.0  ;;  %v499_v58 = vclamps-f32 %v221_v45, 1.0  ;;  %v225_v61 = vmul.f32 %v794_v1, %v177_v43 }
  0x53   : > { %357 = vst [vmem:[%s820_s20 + $0xf0] sm:$0xff] %v494_v39  ;;  %358 = vst [vmem:[%s820_s20 + $0xf8] sm:$0xff] %v495_v44  ;;  %v500_v59 = vclamps-f32 %v222_v46, 1.0  ;;  %v501_v60 = vclamps-f32 %v223_v47, 1.0  ;;  %v502_v63 = vclamps-f32 %v224_v54, 1.0  ;;  %v226_v0 = vmul.f32 %v794_v1, %v178_v48 }
  0x54   : > { %359 = vst [vmem:[%s820_s20 + $0x100] sm:$0xff] %v496_v51  ;;  %360 = vst [vmem:[%s820_s20 + $0x108] sm:$0xff] %v497_v52  ;;  %v227_v2 = vmul.f32 %v794_v1, %v179_v49  ;;  %v228_v3 = vmul.f32 %v794_v1, %v180_v50  ;;  %v503_v4 = vclamps-f32 %v225_v61, 1.0  ;;  %v229_v5 = vmul.f32 %v794_v1, %v181_v55 }
  0x55   : > { %361 = vst [vmem:[%s820_s20 + $0x110] sm:$0xff] %v498_v53  ;;  %362 = vst [vmem:[%s820_s20 + $0x118] sm:$0xff] %v499_v58  ;;  %v230_v6 = vmul.f32 %v794_v1, %v182_v56  ;;  %v231_v7 = vmul.f32 %v794_v1, %v183_v57  ;;  %v504_v8 = vclamps-f32 %v226_v0, 1.0  ;;  %v232_v11 = vmul.f32 %v794_v1, %v184_v62 }
  0x56   : > { %363 = vst [vmem:[%s820_s20 + $0x120] sm:$0xff] %v500_v59  ;;  %364 = vst [vmem:[%s820_s20 + $0x128] sm:$0xff] %v501_v60  ;;  %v505_v9 = vclamps-f32 %v227_v2, 1.0  ;;  %v506_v10 = vclamps-f32 %v228_v3, 1.0  ;;  %v507_v12 = vclamps-f32 %v229_v5, 1.0 }
  0x57   : > { %365 = vst [vmem:[%s820_s20 + $0x130] sm:$0xff] %v502_v63  ;;  %366 = vst [vmem:[%s820_s20 + $0x138] sm:$0xff] %v503_v4  ;;  %v508_v13 = vclamps-f32 %v230_v6, 1.0  ;;  %v509_v14 = vclamps-f32 %v231_v7, 1.0  ;;  %v510_v15 = vclamps-f32 %v232_v11, 1.0 }
  0x58   : > { %367 = vst [vmem:[%s820_s20 + $0x140] sm:$0xff] %v504_v8  ;;  %368 = vst [vmem:[%s820_s20 + $0x148] sm:$0xff] %v505_v9 }
  0x59   : > { %369 = vst [vmem:[%s820_s20 + $0x150] sm:$0xff] %v506_v10  ;;  %370 = vst [vmem:[%s820_s20 + $0x158] sm:$0xff] %v507_v12 }
  0x5a   : > { %371 = vst [vmem:[%s820_s20 + $0x160] sm:$0xff] %v508_v13  ;;  %372 = vst [vmem:[%s820_s20 + $0x168] sm:$0xff] %v509_v14 }
  0x5b   : > { %373 = vst [vmem:[%s820_s20 + $0x170] sm:$0xff] %v510_v15 }
  0x5c   : > { %607 = shalt.err (!%p604_p4)
}
  0x5d   : > { %s608_s10 = scalar_lea.hbm %s941_s4, 6016  ;;  %s612_s18 = scalar_lea.hbm %s991_s2, 12032 }
  0x5e   : > { %p609_p7 = scmp.ne.s32.totalorder %s941_s4, %s608_s10  ;;  %p613_p0 = scmp.lt.u32.totalorder %s941_s4, %s991_s2 }
  0x5f   : > { %p614_p1 = scmp.lt.u32.totalorder %s612_s18, %s608_s10  ;;  %p616_p6 = scmp.lt.u32.totalorder %s608_s10, %s941_s4 }
  0x60   : > { %p610_p8 = pnand %p609_p7, %p999_p11 }
  0x61   : > { %p615_p3 = por %p614_p1, %p613_p0 }
  0x62   : > { %p611_p9 = pneg %p610_p8 }
  0x63   : > { %p617_p12 = por %p616_p6, %p615_p3 }
  0x65   : > { %p618_p13 = pnand %p617_p12, %p611_p9 }
  0x67   : > { %621 = shalt.err (!%p618_p13)
}
  0x68   : > { %520 = dma.vmem_to_hbm [thread:$0]  (%p999_p11), %s943_s30, 6016, %s941_s4, %s375_s5  }
  0x69 PF: > { %s401_s25 = sand.u32 1, %s648_s11   ;;  %p1000_p5 = scmp.ne.s32.totalorder %s995_s22, 0 }
  0x6a   : > { %p1001_p10 = scmp.ge.s32.totalorder %s660_s14, 2  ;;  %s402_s26 = scalar_lea.sflag [#allocation6], %s401_s25 }
  0x6c   : > { %p527_p2 = pnand %p1001_p10, %p1000_p5 }
  0x6e   : > { %643 = dma.done.wait (!%p527_p2), %s402_s26, 6016  }
  0x6f   : > { %645 = vsyncadd (!%p527_p2), %s402_s26, 4294961280  ;;  %p16_p4 = scmp.ge.s32.totalorder %s707_s16, 4   ;;  %s1002_s11 = smov %s652_s12 }
  0x70   : > { %s1003_s12 = smov %s656_s13  ;;  %s1004_s13 = smov %s719_s19 }
  0x71   : > { %s1005_s14 = smov %s707_s16  ;;  %18 = sbr.rel (!%p16_p4) target bundleno = 7 (0x7), region = 69 }
  0x78   :  { %407 = vsyncpa [#allocation5], 1 }
  0x79   :  { %409 = vsyncpa [#allocation5 + $0x1], 1 }
  0x7a   :  { %410 = vsyncpa [#allocation6], 1 }
  0x7b   :  { %412 = vsyncpa [#allocation6 + $0x1], 1 }

</bundles_post_ra>
